<compile_context>
chip_gen: v6e
topology: v6e:2x2x1
jax: 0.10.0
libtpu: 0.0.40
codegen_flags: <defaults>
</compile_context>

<pallas_src>
import jax
import jax.numpy as jnp
from jax.experimental import pallas as pl
from jax.experimental.pallas import tpu as pltpu


def _ifnode_kernel(wm_ref, bias_ref, x_ref, o_ref):
    # wm_ref   : VMEM (T, T)       masked weight (same block every grid step)
    # bias_ref : VMEM (T, 1)       bias (broadcast over lanes)
    # x_ref    : VMEM (T, tile_n)  input tile
    # o_ref    : VMEM (T, tile_n)  output spike tile
    h = jnp.dot(wm_ref[...], x_ref[...], preferred_element_type=jnp.float32)
    o_ref[...] = (h + bias_ref[...] >= 0.0).astype(o_ref.dtype)


def _device_info():
    """(physical VMEM bytes, number of TensorCores per chip). Conservative fallbacks."""
    vmem_bytes = 64 * 1024 * 1024  # conservative (v7x) if query unavailable
    num_tcs = 1
    try:
        vmem_bytes = int(pltpu.get_tpu_info().vmem_capacity_bytes)
    except Exception:
        pass
    try:
        kind = jax.devices()[0].device_kind.lower()
        if "v7" in kind:
            num_tcs = 2
    except Exception:
        pass
    return vmem_bytes, num_tcs


def _choose_tile_n(N, num_tcs, max_tile):
    """Pick the lane tile.

    Single-TC (v5e/v6e): fewest, largest blocks — splitting a mem-bound kernel is
    pure per-step overhead. Two-TC (v7x): an even number of near-equal blocks so
    both cores get balanced HBM work. `max_tile` is a multiple of 128 bounded by
    the VMEM budget and the 65536-lane target.
    """
    if N <= 128:
        return N  # single full-extent block (block == full dim, always legal)

    if N <= max_tile:
        if num_tcs >= 2 and N >= 256:
            half = ((-(-N // 2)) + 127) // 128 * 128  # round_up(ceil(N/2), 128)
            if half < N:
                return half  # exactly 2 near-equal blocks
        return N  # one block covering the whole lane extent

    # Multi-block: near-equal blocks; even count on 2-TC parts.
    nb = pl.cdiv(N, max_tile)
    if num_tcs >= 2 and nb % 2 == 1:
        nb += 1
    tile = ((-(-N // nb)) + 127) // 128 * 128
    return max(128, min(tile, max_tile))


def ifnode5_mask_d(x_seq, weight, bias, mask0, mask1, k, *, tile_n=None,
                   out_dtype=None, target_lanes=65536):
    """x_seq: [T, B, C, H, W] float32. Returns spikes with the same shape.

    out_dtype: None keeps x_seq.dtype (module contract). Pass jnp.bfloat16 to
    halve the writeback traffic (spike values {0,1} are exact in bf16).
    """
    T = x_seq.shape[0]
    x_flat = x_seq.reshape(T, -1)
    N = x_flat.shape[1]
    out_dtype = x_seq.dtype if out_dtype is None else out_dtype
    out_bytes = jnp.dtype(out_dtype).itemsize
    x_bytes = jnp.dtype(x_seq.dtype).itemsize

    vmem_capacity, num_tcs = _device_info()

    # Per-lane VMEM cost: x double-buffered + o double-buffered + h intermediate (f32).
    bytes_per_lane = T * (2 * x_bytes + 2 * out_bytes + 4)
    vmem_budget = vmem_capacity // 2  # leave headroom for compiler scratch
    max_tile = max(128, min(target_lanes, vmem_budget // bytes_per_lane) // 128 * 128)

    if tile_n is None:
        tile_n = _choose_tile_n(N, num_tcs, max_tile)

    # Hoisted once in the wrapper (tiny [T,T] ops). mask1 is all-ones, so the mask
    # folds to (1-k) + k*mask0; kept in general form for parity with the buffers.
    k = jnp.float32(k)
    wm = (weight * (k * mask0 + (1.0 - k) * mask1)).astype(jnp.float32)
    bias_col = bias.reshape(T, 1).astype(jnp.float32)

    grid = (pl.cdiv(N, tile_n),)

    # Always set the scoped-VMEM limit explicitly from the real footprint,
    # clamped to what the device can actually honor (<= 75% of physical VMEM).
    est_vmem = T * tile_n * (2 * x_bytes + 2 * out_bytes + 4) + 4 * T * T + 4 * T
    vmem_limit = max(est_vmem + (2 << 20), 16 << 20)
    vmem_limit = min(vmem_limit, int(0.75 * vmem_capacity))

    out_flat = pl.pallas_call(
        _ifnode_kernel,
        out_shape=jax.ShapeDtypeStruct((T, N), out_dtype),
        grid=grid,
        in_specs=[
            pl.BlockSpec((T, T), lambda j: (0, 0)),        # masked weight
            pl.BlockSpec((T, 1), lambda j: (0, 0)),        # bias column
            pl.BlockSpec((T, tile_n), lambda j: (0, j)),   # x tile
        ],
        out_specs=pl.BlockSpec((T, tile_n), lambda j: (0, j)),
        compiler_params=pltpu.CompilerParams(
            dimension_semantics=("parallel",),
            vmem_limit_bytes=vmem_limit,
        ),
    )(wm, bias_col, x_flat)

    return out_flat.reshape(x_seq.shape)


def init_params(T, key):
    """Deterministic init matching the PyTorch module's __init__."""
    # nn.Linear default: weight ~ U(-1/sqrt(T), 1/sqrt(T)); bias overridden to -1.
    bound = 1.0 / (T ** 0.5)
    weight = jax.random.uniform(key, (T, T), jnp.float32, minval=-bound, maxval=bound)
    bias = jnp.full((T,), -1.0, dtype=jnp.float32)
    mask1 = jnp.ones((T, T), dtype=jnp.float32)
    mask0 = jnp.tril(mask1)
    kk = 0.0  # self.k = 0.0 in DecayMaskedLinear.__init__
    return weight, bias, mask0, mask1, kk


if __name__ == "__main__":
    key = jax.random.PRNGKey(0)
    k_w, k_x = jax.random.split(key)

    T, B, C, H, W = 8, 2, 4, 16, 16   # N = B*C*H*W = 2048
    weight, bias, mask0, mask1, kk = init_params(T, k_w)
    x_seq = jax.random.normal(k_x, (T, B, C, H, W), dtype=jnp.float32)

    spikes = ifnode5_mask_d(x_seq, weight, bias, mask0, mask1, kk)
    jax.block_until_ready(spikes)

    # Reference check in plain JAX (PyTorch addmm + heaviside-surrogate forward).
    wm = weight * (kk * mask0 + (1.0 - kk) * mask1)
    h = bias[:, None] + wm @ x_seq.reshape(T, -1)
    ref = (h >= 0.0).astype(jnp.float32).reshape(x_seq.shape)

    assert spikes.shape == x_seq.shape
    assert spikes.dtype == ref.dtype
    # MXU vs XLA f32 accumulation can differ by an ulp exactly at the threshold;
    # tolerate only points whose pre-activation is within a rounding ulp of zero.
    exact = spikes == ref
    near_threshold = (jnp.abs(h) <= 1e-5).reshape(x_seq.shape)
    assert bool(jnp.all(exact | near_threshold))

    print("KERNEL_OK")
</pallas_src>

<mosaic_0001>
module attributes {stable_mosaic.version = 11 : i64} {
  func.func @_ifnode_kernel(%arg0: i32, %arg1: memref<8x8xf32, #tpu.memory_space<vmem>>, %arg2: memref<8x1xf32, #tpu.memory_space<vmem>>, %arg3: memref<8x2048xf32, #tpu.memory_space<vmem>>, %arg4: memref<8x2048xf32, #tpu.memory_space<vmem>>) attributes {dimension_semantics = [#tpu.dimension_semantics<parallel>], iteration_bounds = array<i64: 1>, scalar_prefetch = 0 : i64, scratch_operands = 0 : i64, tpu.core_type = #tpu.core_type<tc>, window_params = [{pipeline_mode = #tpu.pipeline_mode<synchronous>, transform_indices = @transform_0, window_bounds = array<i64: 8, 8>}, {pipeline_mode = #tpu.pipeline_mode<synchronous>, transform_indices = @transform_1, window_bounds = array<i64: 8, 1>}, {transform_indices = @transform_2, window_bounds = array<i64: 8, 2048>}, {transform_indices = @transform_3, window_bounds = array<i64: 8, 2048>}]} {
    %c0 = arith.constant 0 : index
    %c0_0 = arith.constant 0 : index
    %0 = vector.load %arg1[%c0, %c0_0] : memref<8x8xf32, #tpu.memory_space<vmem>>, vector<8x8xf32>
    %c0_1 = arith.constant 0 : index
    %c0_2 = arith.constant 0 : index
    %1 = vector.load %arg3[%c0_1, %c0_2] : memref<8x2048xf32, #tpu.memory_space<vmem>>, vector<8x2048xf32>
    %cst = arith.constant dense<0.000000e+00> : vector<8x2048xf32>
    %2 = tpu.matmul %0, %1, %cst {dimension_numbers = #tpu.dot_dimension_numbers<[1], [0], [0], [1], [0, 0, 1, 1], [], []>} : vector<8x8xf32>, vector<8x2048xf32>, vector<8x2048xf32> -> vector<8x2048xf32>
    %c0_3 = arith.constant 0 : index
    %c0_4 = arith.constant 0 : index
    %3 = vector.load %arg2[%c0_3, %c0_4] : memref<8x1xf32, #tpu.memory_space<vmem>>, vector<8x1xf32>
    %4 = vector.broadcast %3 : vector<8x1xf32> to vector<8x2048xf32>
    %5 = arith.addf %2, %4 : vector<8x2048xf32>
    %cst_5 = arith.constant 0.000000e+00 : f32
    %6 = vector.broadcast %cst_5 : f32 to vector<8x2048xf32>
    %7 = arith.cmpf oge, %5, %6 : vector<8x2048xf32>
    %8 = arith.extui %7 : vector<8x2048xi1> to vector<8x2048xi32>
    %9 = arith.sitofp %8 : vector<8x2048xi32> to vector<8x2048xf32>
    %c0_6 = arith.constant 0 : index
    %c0_7 = arith.constant 0 : index
    %10 = vector.load %arg4[%c0_6, %c0_7] : memref<8x2048xf32, #tpu.memory_space<vmem>>, vector<8x2048xf32>
    tpu.vector_store %arg4[%c0_6, %c0_7], %9 {strides = array<i32>} : memref<8x2048xf32, #tpu.memory_space<vmem>>, vector<8x2048xf32>,
    return
  }
  func.func @transform_0(%arg0: i32) -> (i32, i32) {
    %c0_i32 = arith.constant 0 : i32
    %c0_i32_0 = arith.constant 0 : i32
    %c0_i32_1 = arith.constant 0 : i32
    return %c0_i32, %c0_i32_0 : i32, i32
  }
  func.func @transform_1(%arg0: i32) -> (i32, i32) {
    %c0_i32 = arith.constant 0 : i32
    %c0_i32_0 = arith.constant 0 : i32
    %c0_i32_1 = arith.constant 0 : i32
    return %c0_i32, %c0_i32_0 : i32, i32
  }
  func.func @transform_2(%arg0: i32) -> (i32, i32) {
    %c0_i32 = arith.constant 0 : i32
    %c0_i32_0 = arith.constant 0 : i32
    return %c0_i32, %arg0 : i32, i32
  }
  func.func @transform_3(%arg0: i32) -> (i32, i32) {
    %c0_i32 = arith.constant 0 : i32
    %c0_i32_0 = arith.constant 0 : i32
    return %c0_i32, %arg0 : i32, i32
  }
}

</mosaic_0001>

<bundles_post_ra>
// kernel: tpu_custom_call.1
= control target key start
LH: loop header
LB: loop body
LE: loop exit
PB: predicated region body
PF: predicated region fallthrough
CT: control target
= control target key end

     0   :  { %8 = vsyncpa [#allocation3], 0  ;;  %s860_s0 = inlined_call_operand.vmem [shape: f32[8,8], index: 0, kind: input, shape index: {}]   ;;  %s861_s1 = inlined_call_operand.vmem [shape: f32[8,1], index: 1, kind: input, shape index: {}]   ;;  %s862_s2 = inlined_call_operand.hbm [shape: f32[8,2048], index: 2, kind: input, shape index: {}]   ;;  %s863_s3 = inlined_call_operand.hbm [shape: f32[8,2048], index: 3, kind: output, shape index: {}]  }
   0x1   :  { %9 = vsyncpa [#allocation4], 0  ;;  %s774_s12 = smov [#allocation2]  }
   0x2   :  { %s20_s13 = sshll.u32 %s774_s12, 4  ;;  %s21_s13 = int_to_ptr.vmem [resolvable:$true] %s20_s13 }
   0x3   :  { %s738_s14 = scalar_lea.vmem %s21_s13, 2048  ;;  %p743_p1 = scmp.lt.s32.totalorder %s21_s13, %s21_s13 }
   0x4   :  { %p739_p0 = scmp.ne.s32.totalorder %s21_s13, %s738_s14  ;;  %p744_p2 = scmp.lt.s32.totalorder %s738_s14, %s738_s14 }
   0x6   :  { %p745_p3 = por %p744_p2, %p743_p1 }
   0x8   :  { %p746_p4 = pnand %p745_p3, %p739_p0 }
   0xa   :  { %749 = shalt.err (!%p746_p4)
}
   0xb   :  { %23 = dma.hbm_to_vmem [thread:$0]  %s862_s2, 2048, %s21_s13, [#allocation3]  }
   0xc   :  { %770 = dma.done.wait [#allocation3], 2048  }
   0xd   :  { %771 = vsyncadd [#allocation3], 4294965248  ;;  %v775_v0 = vmov 0.0   ;;  %v776_v1 = vmov 0   ;;  %v29_v2 = vld [vmem:[#allocation2 + $0x8] sm:$0xff]  ;;  %v31_v3 = vld [vmem:[#allocation2 + $0x18] sm:$0xff] }
   0xe   :  { %118 = vmatprep.mubr.f32.mxu0 %v775_v0  ;;  %189 = vmatprep.mubr.f32.mxu1 %v775_v0  ;;  %v28_v4 = vld [vmem:[#allocation2] sm:$0xff]  ;;  %vm50_vm0 = vcmask 64512   ;;  %v30_v5 = vld [vmem:[#allocation2 + $0x10] sm:$0xff]  ;;  %v33_v7 = vld [vmem:[#allocation2 + $0x28] sm:$0xff] }
   0xf   :  { %729 = vset.pattern.permute.xlu0 %v776_v1  ;;  %84 = vmatprep.subr.mxu0 %v29_v2  ;;  %v27_v6 = vld [vmem:[%s860_s0] sm:$0xff]  ;;  %v35_v8 = vld [vmem:[#allocation2 + $0x38] sm:$0xff]  ;;  %v34_v10 = vld [vmem:[#allocation2 + $0x30] sm:$0xff] }
  0x10   :  { %155 = vmatprep.subr.mxu1 %v31_v3  ;;  %85 = vmatpush1.msra.mxu0 %v28_v4  ;;  %v32_v9 = vld [vmem:[#allocation2 + $0x20] sm:$0xff]  ;;  %v37_v11 = vld [vmem:[#allocation2 + $0x48] sm:$0xff]  ;;  %v39_v12 = vld [vmem:[#allocation2 + $0x58] sm:$0xff] }
  0x11   :  { %156 = vmatpush1.msra.mxu1 %v30_v5  ;;  %701 = vmatmul.mubr.msk.f32.vlgmr.msra.gmra.mxu0 %vm50_vm0, %v27_v6  ;;  %v36_v13 = vld [vmem:[#allocation2 + $0x40] sm:$0xff]  ;;  %v38_v14 = vld [vmem:[#allocation2 + $0x50] sm:$0xff]  ;;  %v41_v15 = vld [vmem:[#allocation2 + $0x68] sm:$0xff] }
  0x12   :  { %702 = vmatmul.mubr.msk.f32.vlgmr.msra.gmra.mxu1 %vm50_vm0, %v27_v6  ;;  %226 = vmatprep.subr.mxu0 %v33_v7  ;;  %v43_v16 = vld [vmem:[#allocation2 + $0x78] sm:$0xff]  ;;  %v40_v17 = vld [vmem:[#allocation2 + $0x60] sm:$0xff]  ;;  %v42_v18 = vld [vmem:[#allocation2 + $0x70] sm:$0xff] }
  0x13   :  { %297 = vmatprep.subr.mxu1 %v35_v8  ;;  %227 = vmatpush1.msra.mxu0 %v32_v9  ;;  %v44_v19 = vld [vmem:[%s861_s1] sm:$0xff]  ;;  %s777_s1 = smov [#allocation5]  }
  0x14   :  { %298 = vmatpush1.msra.mxu1 %v34_v10  ;;  %260 = vmatprep.mubr.f32.mxu0 %v775_v0  ;;  %s692_s19 = sshll.u32 %s777_s1, 4  ;;  %s693_s19 = int_to_ptr.vmem [resolvable:$true] %s692_s19 }
  0x15   :  { %331 = vmatprep.mubr.f32.mxu1 %v775_v0  ;;  %703 = vmatmul.mubr.msk.f32.vlgmr.msra.gmra.mxu0 %vm50_vm0, %v27_v6  ;;  %s750_s20 = scalar_lea.vmem %s693_s19, 2048  ;;  %p755_p6 = scmp.lt.s32.totalorder %s693_s19, %s693_s19 }
  0x16   :  { %704 = vmatmul.mubr.msk.f32.vlgmr.msra.gmra.mxu1 %vm50_vm0, %v27_v6  ;;  %368 = vmatprep.subr.mxu0 %v37_v11  ;;  %p751_p5 = scmp.ne.s32.totalorder %s693_s19, %s750_s20  ;;  %p756_p7 = scmp.lt.s32.totalorder %s750_s20, %s750_s20 }
  0x17   :  { %439 = vmatprep.subr.mxu1 %v39_v12  ;;  %369 = vmatpush1.msra.mxu0 %v36_v13 }
  0x18   :  { %440 = vmatpush1.msra.mxu1 %v38_v14  ;;  %402 = vmatprep.mubr.f32.mxu0 %v775_v0  ;;  %p757_p8 = por %p756_p7, %p755_p6 }
  0x19   :  { %473 = vmatprep.mubr.f32.mxu1 %v775_v0  ;;  %705 = vmatmul.mubr.msk.f32.vlgmr.msra.gmra.mxu0 %vm50_vm0, %v27_v6 }
  0x1a   :  { %706 = vmatmul.mubr.msk.f32.vlgmr.msra.gmra.mxu1 %vm50_vm0, %v27_v6  ;;  %510 = vmatprep.subr.mxu0 %v41_v15  ;;  %p758_p9 = pnand %p757_p8, %p751_p5 }
  0x1b   :  { %581 = vmatprep.subr.mxu1 %v43_v16  ;;  %511 = vmatpush1.msra.mxu0 %v40_v17 }
  0x1c   :  { %582 = vmatpush1.msra.mxu1 %v42_v18  ;;  %544 = vmatprep.mubr.f32.mxu0 %v775_v0 }
  0x1d   :  { %615 = vmatprep.mubr.f32.mxu1 %v775_v0  ;;  %707 = vmatmul.mubr.msk.f32.vlgmr.msra.gmra.mxu0 %vm50_vm0, %v27_v6 }
  0x1e   :  { %708 = vmatmul.mubr.msk.f32.vlgmr.msra.gmra.mxu1 %vm50_vm0, %v27_v6  ;;  %47 = vperm.xlu0 %729, %v44_v19  }
  0x99   :  { %v823_v20 = vpop.permute.xlu0 %47 }
  0xd1   :  { %v120_v21 = vpop.f32.mrf.mxu0 }
  0xd2   :  { %v191_v22 = vpop.f32.mrf.mxu1  ;;  %v121_v23 = vadd.f32 %v120_v21, %v823_v20 }
  0xd3   :  { %v192_v24 = vadd.f32 %v191_v22, %v823_v20  ;;  %v122_v25 = vpop.f32.mrf.mxu0 }
  0xd4   :  { %v193_v26 = vpop.f32.mrf.mxu1  ;;  %vm622_vm1 = vcmp.ge.f32.partialorder %v121_v23, 0.0  ;;  %v123_v27 = vadd.f32 %v122_v25, %v823_v20 }
  0xd5   :  { %vm624_vm2 = vcmp.ge.f32.partialorder %v192_v24, 0.0  ;;  %v194_v28 = vadd.f32 %v193_v26, %v823_v20  ;;  %v709_v29 = vsel %vm622_vm1, 1.0, %v775_v0  ;;  %v262_v31 = vpop.f32.mrf.mxu0 }
  0xd6   :  { %v711_v30 = vsel %vm624_vm2, 1.0, %v775_v0  ;;  %v333_v32 = vpop.f32.mrf.mxu1  ;;  %670 = vst [vmem:[#allocation5] sm:$0xff] %v709_v29  ;;  %vm623_vm3 = vcmp.ge.f32.partialorder %v123_v27, 0.0  ;;  %v263_v33 = vadd.f32 %v262_v31, %v823_v20 }
  0xd7   :  { %672 = vst [vmem:[#allocation5 + $0x10] sm:$0xff] %v711_v30  ;;  %vm625_vm4 = vcmp.ge.f32.partialorder %v194_v28, 0.0  ;;  %v334_v34 = vadd.f32 %v333_v32, %v823_v20  ;;  %v710_v35 = vsel %vm623_vm3, 1.0, %v775_v0  ;;  %v264_v37 = vpop.f32.mrf.mxu0 }
  0xd8   :  { %v712_v36 = vsel %vm625_vm4, 1.0, %v775_v0  ;;  %v335_v38 = vpop.f32.mrf.mxu1  ;;  %671 = vst [vmem:[#allocation5 + $0x8] sm:$0xff] %v710_v35  ;;  %vm626_vm5 = vcmp.ge.f32.partialorder %v263_v33, 0.0  ;;  %v265_v39 = vadd.f32 %v264_v37, %v823_v20 }
  0xd9   :  { %673 = vst [vmem:[#allocation5 + $0x18] sm:$0xff] %v712_v36  ;;  %vm628_vm6 = vcmp.ge.f32.partialorder %v334_v34, 0.0  ;;  %v336_v40 = vadd.f32 %v335_v38, %v823_v20  ;;  %v713_v41 = vsel %vm626_vm5, 1.0, %v775_v0  ;;  %v404_v43 = vpop.f32.mrf.mxu0 }
  0xda   :  { %v715_v42 = vsel %vm628_vm6, 1.0, %v775_v0  ;;  %v475_v44 = vpop.f32.mrf.mxu1  ;;  %674 = vst [vmem:[#allocation5 + $0x20] sm:$0xff] %v713_v41  ;;  %vm627_vm7 = vcmp.ge.f32.partialorder %v265_v39, 0.0  ;;  %v405_v45 = vadd.f32 %v404_v43, %v823_v20 }
  0xdb   :  { %676 = vst [vmem:[#allocation5 + $0x30] sm:$0xff] %v715_v42  ;;  %vm629_vm8 = vcmp.ge.f32.partialorder %v336_v40, 0.0  ;;  %v476_v46 = vadd.f32 %v475_v44, %v823_v20  ;;  %v714_v47 = vsel %vm627_vm7, 1.0, %v775_v0  ;;  %v406_v49 = vpop.f32.mrf.mxu0 }
  0xdc   :  { %v716_v48 = vsel %vm629_vm8, 1.0, %v775_v0  ;;  %v477_v50 = vpop.f32.mrf.mxu1  ;;  %675 = vst [vmem:[#allocation5 + $0x28] sm:$0xff] %v714_v47  ;;  %vm630_vm9 = vcmp.ge.f32.partialorder %v405_v45, 0.0  ;;  %v407_v51 = vadd.f32 %v406_v49, %v823_v20 }
  0xdd   :  { %677 = vst [vmem:[#allocation5 + $0x38] sm:$0xff] %v716_v48  ;;  %vm632_vm10 = vcmp.ge.f32.partialorder %v476_v46, 0.0  ;;  %v478_v52 = vadd.f32 %v477_v50, %v823_v20  ;;  %v717_v53 = vsel %vm630_vm9, 1.0, %v775_v0  ;;  %v546_v55 = vpop.f32.mrf.mxu0 }
  0xde   :  { %v719_v54 = vsel %vm632_vm10, 1.0, %v775_v0  ;;  %v617_v56 = vpop.f32.mrf.mxu1  ;;  %678 = vst [vmem:[#allocation5 + $0x40] sm:$0xff] %v717_v53  ;;  %vm631_vm11 = vcmp.ge.f32.partialorder %v407_v51, 0.0  ;;  %v547_v57 = vadd.f32 %v546_v55, %v823_v20 }
  0xdf   :  { %680 = vst [vmem:[#allocation5 + $0x50] sm:$0xff] %v719_v54  ;;  %vm633_vm12 = vcmp.ge.f32.partialorder %v478_v52, 0.0  ;;  %v618_v58 = vadd.f32 %v617_v56, %v823_v20  ;;  %v718_v59 = vsel %vm631_vm11, 1.0, %v775_v0  ;;  %v548_v61 = vpop.f32.mrf.mxu0 }
  0xe0   :  { %v720_v60 = vsel %vm633_vm12, 1.0, %v775_v0  ;;  %v619_v62 = vpop.f32.mrf.mxu1  ;;  %679 = vst [vmem:[#allocation5 + $0x48] sm:$0xff] %v718_v59  ;;  %vm634_vm13 = vcmp.ge.f32.partialorder %v547_v57, 0.0  ;;  %v549_v63 = vadd.f32 %v548_v61, %v823_v20 }
  0xe1   :  { %681 = vst [vmem:[#allocation5 + $0x58] sm:$0xff] %v720_v60  ;;  %vm636_vm14 = vcmp.ge.f32.partialorder %v618_v58, 0.0  ;;  %v620_v1 = vadd.f32 %v619_v62, %v823_v20  ;;  %v721_v2 = vsel %vm634_vm13, 1.0, %v775_v0 }
  0xe2   :  { %v723_v3 = vsel %vm636_vm14, 1.0, %v775_v0  ;;  %682 = vst [vmem:[#allocation5 + $0x60] sm:$0xff] %v721_v2  ;;  %vm635_vm15 = vcmp.ge.f32.partialorder %v549_v63, 0.0 }
  0xe3   :  { %684 = vst [vmem:[#allocation5 + $0x70] sm:$0xff] %v723_v3  ;;  %vm637_vm0 = vcmp.ge.f32.partialorder %v620_v1, 0.0  ;;  %v722_v4 = vsel %vm635_vm15, 1.0, %v775_v0 }
  0xe4   :  { %v724_v5 = vsel %vm637_vm0, 1.0, %v775_v0  ;;  %683 = vst [vmem:[#allocation5 + $0x68] sm:$0xff] %v722_v4 }
  0xe5   :  { %685 = vst [vmem:[#allocation5 + $0x78] sm:$0xff] %v724_v5 }
  0xe6   :  { %761 = shalt.err (!%p758_p9)
}
  0xe7   :  { %695 = dma.vmem_to_hbm [thread:$0]  %s693_s19, 2048, %s863_s3, [#allocation4]  }
  0xe8   :  { %772 = dma.done.wait [#allocation4], 2048  }
  0xe9   :  { %773 = vsyncadd [#allocation4], 4294965248 }
  0xea   :  { %699 = vsyncpa [#allocation3], 1 }
  0xeb   :  { %700 = vsyncpa [#allocation4], 1 }

</bundles_post_ra>
